<compile_context>
chip_gen: v7x
topology: tpu7x:2x2x1
jax: 0.10.0
libtpu: 0.0.40
codegen_flags: <defaults>
</compile_context>

<pallas_src>
import jax
import jax.numpy as jnp
from jax.experimental import pallas as pl
from jax.experimental.pallas import tpu as pltpu

LANE = 128      # vreg lane width
SUBLANE = 8     # f32 vreg sublane count
TB_CAP = 512    # max batch rows per tile (well under v7x's 32 MiB scoped VMEM)


def _round_up(n, m):
    return ((n + m - 1) // m) * m


def qnet_kernel(x_ref, w1_ref, w2_ref, w3_ref, b_ref, o_ref):
    """One batch tile: relu(relu(x@W1+b1)@W2+b2)@W3+b3 on padded, lane-dense data."""
    hid = w1_ref.shape[1]
    adp = w3_ref.shape[1]
    # fc1 + ReLU  (bf16 operands on the MXU, f32 accumulation & f32 elementwise)
    h1 = jnp.dot(x_ref[...], w1_ref[...], preferred_element_type=jnp.float32)
    h1 = jnp.maximum(h1 + b_ref[0:1, :hid], 0.0)
    # fc2 + ReLU
    h2 = jnp.dot(h1.astype(jnp.bfloat16), w2_ref[...],
                 preferred_element_type=jnp.float32)
    h2 = jnp.maximum(h2 + b_ref[1:2, :hid], 0.0)
    # fc3 (no activation)
    out = jnp.dot(h2.astype(jnp.bfloat16), w3_ref[...],
                  preferred_element_type=jnp.float32)
    o_ref[...] = (out + b_ref[2:3, :adp]).astype(o_ref.dtype)


def qnetwork_forward(x, params):
    """x: (B, state_dim) float32. params: dict w1,b1,w2,b2,w3,b3 with (in, out) weights."""
    B, state_dim = x.shape
    hidden = params["w1"].shape[1]
    action_dim = params["w3"].shape[1]

    # Lane-dense padded feature dims.
    sd_p = _round_up(state_dim, LANE)
    hid_p = _round_up(hidden, LANE)
    ad_p = _round_up(action_dim, LANE)
    bw = max(hid_p, ad_p)

    # Batch tile: multiple of 8 sublanes, capped for VMEM (v7x-safe).
    TB = min(TB_CAP, _round_up(B, SUBLANE))
    Bp = _round_up(B, TB)

    bf16 = jnp.bfloat16
    # Zero-pad + cast MXU operands to bf16 (biases stay f32).
    xp = jnp.zeros((Bp, sd_p), bf16).at[:B, :state_dim].set(x.astype(bf16))
    w1 = jnp.zeros((sd_p, hid_p), bf16).at[:state_dim, :hidden].set(
        params["w1"].astype(bf16))
    w2 = jnp.zeros((hid_p, hid_p), bf16).at[:hidden, :hidden].set(
        params["w2"].astype(bf16))
    w3 = jnp.zeros((hid_p, ad_p), bf16).at[:hidden, :action_dim].set(
        params["w3"].astype(bf16))
    biases = jnp.zeros((3, bw), jnp.float32)
    biases = biases.at[0, :hidden].set(params["b1"])
    biases = biases.at[1, :hidden].set(params["b2"])
    biases = biases.at[2, :action_dim].set(params["b3"])

    out_p = pl.pallas_call(
        qnet_kernel,
        out_shape=jax.ShapeDtypeStruct((Bp, ad_p), jnp.float32),
        grid=(Bp // TB,),
        in_specs=[
            pl.BlockSpec((TB, sd_p), lambda i: (i, 0)),      # x: streams over B
            pl.BlockSpec((sd_p, hid_p), lambda i: (0, 0)),   # W1: resident
            pl.BlockSpec((hid_p, hid_p), lambda i: (0, 0)),  # W2: resident
            pl.BlockSpec((hid_p, ad_p), lambda i: (0, 0)),   # W3: resident
            pl.BlockSpec((3, bw), lambda i: (0, 0)),         # packed biases: resident
        ],
        out_specs=pl.BlockSpec((TB, ad_p), lambda i: (i, 0)),
        compiler_params=pltpu.CompilerParams(
            dimension_semantics=("parallel",)),
    )(xp, w1, w2, w3, biases)

    # Strip batch + lane padding outside the kernel.
    return out_p[:B, :action_dim]


def init_params(key, state_dim, action_dim, hidden=64):
    """Deterministic init mimicking PyTorch nn.Linear default
    (uniform(-1/sqrt(fan_in), 1/sqrt(fan_in))). Weights stored (in, out)."""
    def linear(k, fan_in, fan_out):
        kw, kb = jax.random.split(k)
        bound = 1.0 / jnp.sqrt(fan_in)
        w = jax.random.uniform(kw, (fan_in, fan_out), jnp.float32, -bound, bound)
        b = jax.random.uniform(kb, (fan_out,), jnp.float32, -bound, bound)
        return w, b

    k1, k2, k3 = jax.random.split(key, 3)
    w1, b1 = linear(k1, state_dim, hidden)
    w2, b2 = linear(k2, hidden, hidden)
    w3, b3 = linear(k3, hidden, action_dim)
    return {"w1": w1, "b1": b1, "w2": w2, "b2": b2, "w3": w3, "b3": b3}


def qnetwork_ref(x, p):
    """Exact f32 reference (PyTorch forward semantics)."""
    h1 = jnp.maximum(x @ p["w1"] + p["b1"], 0.0)
    h2 = jnp.maximum(h1 @ p["w2"] + p["b2"], 0.0)
    return h2 @ p["w3"] + p["b3"]


def qnetwork_ref_bf16(x, p):
    """Numerics-matched reference: bf16-rounded MXU operands, f32 accumulation."""
    def bf(a):
        return a.astype(jnp.bfloat16).astype(jnp.float32)
    h1 = jnp.maximum(jnp.dot(bf(x), bf(p["w1"])) + p["b1"], 0.0)
    h2 = jnp.maximum(jnp.dot(bf(h1), bf(p["w2"])) + p["b2"], 0.0)
    return jnp.dot(bf(h2), bf(p["w3"])) + p["b3"]


if __name__ == "__main__":
    key = jax.random.PRNGKey(0)
    kx, kp, kx2 = jax.random.split(key, 3)

    state_dim, action_dim = 4, 2   # CartPole-style
    params = init_params(kp, state_dim, action_dim)
    fwd = jax.jit(qnetwork_forward)

    # Small inference-style batch.
    x_small = jax.random.normal(kx, (2, state_dim), jnp.float32)
    out_small = jax.block_until_ready(fwd(x_small, params))
    assert out_small.shape == (2, action_dim)

    # Batched training-style forward exercising the multi-tile grid + batch padding.
    x_big = jax.random.normal(kx2, (600, state_dim), jnp.float32)
    out_big = jax.block_until_ready(fwd(x_big, params))
    assert out_big.shape == (600, action_dim)

    for x, out in ((x_small, out_small), (x_big, out_big)):
        ref_m = qnetwork_ref_bf16(x, params)   # same bf16 rounding as the kernel
        assert jnp.allclose(out, ref_m, atol=1e-4, rtol=1e-3), "mismatch vs bf16 ref"
        ref_f = qnetwork_ref(x, params)        # exact f32 semantics, loose tol for bf16
        assert jnp.allclose(out, ref_f, atol=3e-2, rtol=3e-2), "mismatch vs f32 ref"

    print("KERNEL_OK")
</pallas_src>

<mosaic_0001>
module attributes {stable_mosaic.version = 11 : i64} {
  func.func @qnet_kernel(%arg0: i32, %arg1: memref<8x128xbf16, #tpu.memory_space<vmem>>, %arg2: memref<128x128xbf16, #tpu.memory_space<vmem>>, %arg3: memref<128x128xbf16, #tpu.memory_space<vmem>>, %arg4: memref<128x128xbf16, #tpu.memory_space<vmem>>, %arg5: memref<3x128xf32, #tpu.memory_space<vmem>>, %arg6: memref<8x128xf32, #tpu.memory_space<vmem>>) attributes {dimension_semantics = [#tpu.dimension_semantics<parallel>], iteration_bounds = array<i64: 1>, scalar_prefetch = 0 : i64, scratch_operands = 0 : i64, tpu.core_type = #tpu.core_type<tc>, window_params = [{transform_indices = @transform_0, window_bounds = array<i64: 8, 128>}, {pipeline_mode = #tpu.pipeline_mode<synchronous>, transform_indices = @transform_1, window_bounds = array<i64: 128, 128>}, {pipeline_mode = #tpu.pipeline_mode<synchronous>, transform_indices = @transform_2, window_bounds = array<i64: 128, 128>}, {pipeline_mode = #tpu.pipeline_mode<synchronous>, transform_indices = @transform_3, window_bounds = array<i64: 128, 128>}, {pipeline_mode = #tpu.pipeline_mode<synchronous>, transform_indices = @transform_4, window_bounds = array<i64: 3, 128>}, {transform_indices = @transform_5, window_bounds = array<i64: 8, 128>}]} {
    %c0 = arith.constant 0 : index
    %c0_0 = arith.constant 0 : index
    %0 = vector.load %arg1[%c0, %c0_0] : memref<8x128xbf16, #tpu.memory_space<vmem>>, vector<8x128xbf16>
    %c0_1 = arith.constant 0 : index
    %c0_2 = arith.constant 0 : index
    %1 = vector.load %arg2[%c0_1, %c0_2] : memref<128x128xbf16, #tpu.memory_space<vmem>>, vector<128x128xbf16>
    %cst = arith.constant dense<0.000000e+00> : vector<8x128xf32>
    %2 = tpu.matmul %0, %1, %cst {dimension_numbers = #tpu.dot_dimension_numbers<[1], [0], [0], [1], [0, 0, 1, 1], [], []>} : vector<8x128xbf16>, vector<128x128xbf16>, vector<8x128xf32> -> vector<8x128xf32>
    %c0_3 = arith.constant 0 : index
    %c0_4 = arith.constant 0 : index
    %3 = vector.load %arg5[%c0_3, %c0_4] : memref<3x128xf32, #tpu.memory_space<vmem>>, vector<1x128xf32>
    %4 = vector.broadcast %3 : vector<1x128xf32> to vector<8x128xf32>
    %5 = arith.addf %2, %4 : vector<8x128xf32>
    %cst_5 = arith.constant 0.000000e+00 : f32
    %6 = vector.broadcast %cst_5 : f32 to vector<8x128xf32>
    %7 = arith.maximumf %5, %6 : vector<8x128xf32>
    %8 = arith.truncf %7 : vector<8x128xf32> to vector<8x128xbf16>
    %c0_6 = arith.constant 0 : index
    %c0_7 = arith.constant 0 : index
    %9 = vector.load %arg3[%c0_6, %c0_7] : memref<128x128xbf16, #tpu.memory_space<vmem>>, vector<128x128xbf16>
    %cst_8 = arith.constant dense<0.000000e+00> : vector<8x128xf32>
    %10 = tpu.matmul %8, %9, %cst_8 {dimension_numbers = #tpu.dot_dimension_numbers<[1], [0], [0], [1], [0, 0, 1, 1], [], []>} : vector<8x128xbf16>, vector<128x128xbf16>, vector<8x128xf32> -> vector<8x128xf32>
    %c1 = arith.constant 1 : index
    %c0_9 = arith.constant 0 : index
    %11 = vector.load %arg5[%c1, %c0_9] : memref<3x128xf32, #tpu.memory_space<vmem>>, vector<1x128xf32>
    %12 = vector.broadcast %11 : vector<1x128xf32> to vector<8x128xf32>
    %13 = arith.addf %10, %12 : vector<8x128xf32>
    %cst_10 = arith.constant 0.000000e+00 : f32
    %14 = vector.broadcast %cst_10 : f32 to vector<8x128xf32>
    %15 = arith.maximumf %13, %14 : vector<8x128xf32>
    %16 = arith.truncf %15 : vector<8x128xf32> to vector<8x128xbf16>
    %c0_11 = arith.constant 0 : index
    %c0_12 = arith.constant 0 : index
    %17 = vector.load %arg4[%c0_11, %c0_12] : memref<128x128xbf16, #tpu.memory_space<vmem>>, vector<128x128xbf16>
    %cst_13 = arith.constant dense<0.000000e+00> : vector<8x128xf32>
    %18 = tpu.matmul %16, %17, %cst_13 {dimension_numbers = #tpu.dot_dimension_numbers<[1], [0], [0], [1], [0, 0, 1, 1], [], []>} : vector<8x128xbf16>, vector<128x128xbf16>, vector<8x128xf32> -> vector<8x128xf32>
    %c2 = arith.constant 2 : index
    %c0_14 = arith.constant 0 : index
    %19 = vector.load %arg5[%c2, %c0_14] : memref<3x128xf32, #tpu.memory_space<vmem>>, vector<1x128xf32>
    %20 = vector.broadcast %19 : vector<1x128xf32> to vector<8x128xf32>
    %21 = arith.addf %18, %20 : vector<8x128xf32>
    %c0_15 = arith.constant 0 : index
    %c0_16 = arith.constant 0 : index
    %22 = vector.load %arg6[%c0_15, %c0_16] : memref<8x128xf32, #tpu.memory_space<vmem>>, vector<8x128xf32>
    tpu.vector_store %arg6[%c0_15, %c0_16], %21 {strides = array<i32>} : memref<8x128xf32, #tpu.memory_space<vmem>>, vector<8x128xf32>,
    return
  }
  func.func @transform_0(%arg0: i32) -> (i32, i32) {
    %c0_i32 = arith.constant 0 : i32
    %c0_i32_0 = arith.constant 0 : i32
    return %arg0, %c0_i32 : i32, i32
  }
  func.func @transform_1(%arg0: i32) -> (i32, i32) {
    %c0_i32 = arith.constant 0 : i32
    %c0_i32_0 = arith.constant 0 : i32
    %c0_i32_1 = arith.constant 0 : i32
    return %c0_i32, %c0_i32_0 : i32, i32
  }
  func.func @transform_2(%arg0: i32) -> (i32, i32) {
    %c0_i32 = arith.constant 0 : i32
    %c0_i32_0 = arith.constant 0 : i32
    %c0_i32_1 = arith.constant 0 : i32
    return %c0_i32, %c0_i32_0 : i32, i32
  }
  func.func @transform_3(%arg0: i32) -> (i32, i32) {
    %c0_i32 = arith.constant 0 : i32
    %c0_i32_0 = arith.constant 0 : i32
    %c0_i32_1 = arith.constant 0 : i32
    return %c0_i32, %c0_i32_0 : i32, i32
  }
  func.func @transform_4(%arg0: i32) -> (i32, i32) {
    %c0_i32 = arith.constant 0 : i32
    %c0_i32_0 = arith.constant 0 : i32
    %c0_i32_1 = arith.constant 0 : i32
    return %c0_i32, %c0_i32_0 : i32, i32
  }
  func.func @transform_5(%arg0: i32) -> (i32, i32) {
    %c0_i32 = arith.constant 0 : i32
    %c0_i32_0 = arith.constant 0 : i32
    return %arg0, %c0_i32 : i32, i32
  }
}

</mosaic_0001>

<bundles_post_ra>
// kernel: qnetwork_forward.1
= control target key start
LH: loop header
LB: loop body
LE: loop exit
PB: predicated region body
PF: predicated region fallthrough
CT: control target
= control target key end

     0   :  { %v498_v0 = vmov 0.0   ;;  %vm499_vm0 = vmmov 0   ;;  %s647_s1 = inlined_call_operand.vmem [shape: bf16[128,128], index: 1, kind: input, shape index: {}]   ;;  %s648_s2 = inlined_call_operand.vmem [shape: bf16[128,128], index: 2, kind: input, shape index: {}]   ;;  %s649_s0 = inlined_call_operand.vmem [shape: bf16[8,128], index: 0, kind: input, shape index: {}]   ;;  %s650_s3 = inlined_call_operand.vmem [shape: bf16[128,128], index: 3, kind: input, shape index: {}]   ;;  %s651_s4 = inlined_call_operand.vmem [shape: f32[3,128], index: 4, kind: input, shape index: {}]   ;;  %s652_s5 = inlined_call_operand.vmem [shape: f32[8,128], index: 5, kind: output, shape index: {}]  }
   0x1   :  { %412 = vmatprep.subr.bf16.mxu0 %v498_v0  ;;  %v474_v1 = vld [vmem:[%s647_s1] sm:$0xff]   ;;  %428 = vmatprep.mubr.msk.bf16.mxu0 %vm499_vm0, %v498_v0  ;;  %v475_v2 = vld [vmem:[%s647_s1 + $0x8] sm:$0xff]   ;;  %v476_v3 = vld [vmem:[%s647_s1 + $0x10] sm:$0xff]  }
   0x2   :  { %432 = vmatprep.subr.bf16.mxu1 %v498_v0  ;;  %448 = vmatprep.mubr.msk.bf16.mxu1 %vm499_vm0, %v498_v0  ;;  %v482_v4 = vld [vmem:[%s648_s2] sm:$0xff]   ;;  %v477_v5 = vld [vmem:[%s647_s1 + $0x18] sm:$0xff]   ;;  %v483_v6 = vld [vmem:[%s648_s2 + $0x8] sm:$0xff]  }
   0x3   :  { %413 = vmatpush3.bf16.msra.mxu0 %v474_v1  ;;  %433 = vmatpush3.bf16.msra.mxu1 %v482_v4  ;;  %v478_v7 = vld [vmem:[%s647_s1 + $0x20] sm:$0xff]   ;;  %v484_v8 = vld [vmem:[%s648_s2 + $0x10] sm:$0xff]   ;;  %v479_v9 = vld [vmem:[%s647_s1 + $0x28] sm:$0xff]  }
   0x4   :  { %414 = vmatprep.subr.bf16.mxu0 %v498_v0  ;;  %434 = vmatprep.subr.bf16.mxu1 %v498_v0  ;;  %v485_v10 = vld [vmem:[%s648_s2 + $0x18] sm:$0xff]   ;;  %v480_v11 = vld [vmem:[%s647_s1 + $0x30] sm:$0xff]   ;;  %v486_v12 = vld [vmem:[%s648_s2 + $0x20] sm:$0xff]  }
   0x5   :  { %v481_v13 = vld [vmem:[%s647_s1 + $0x38] sm:$0xff]   ;;  %v487_v14 = vld [vmem:[%s648_s2 + $0x28] sm:$0xff]   ;;  %v21_v15 = vld [vmem:[%s649_s0] sm:$0xf] }
   0x6   :  { %v488_v16 = vld [vmem:[%s648_s2 + $0x30] sm:$0xff]   ;;  %v489_v17 = vld [vmem:[%s648_s2 + $0x38] sm:$0xff]   ;;  %v490_v18 = vld [vmem:[%s650_s3] sm:$0xff]  }
   0x7   :  { %415 = vmatpush3.bf16.msra.mxu0 %v475_v2  ;;  %435 = vmatpush3.bf16.msra.mxu1 %v483_v6  ;;  %v491_v19 = vld [vmem:[%s650_s3 + $0x8] sm:$0xff]   ;;  %v492_v20 = vld [vmem:[%s650_s3 + $0x10] sm:$0xff]   ;;  %v493_v21 = vld [vmem:[%s650_s3 + $0x18] sm:$0xff]  }
   0x8   :  { %416 = vmatprep.subr.bf16.mxu0 %v498_v0  ;;  %436 = vmatprep.subr.bf16.mxu1 %v498_v0  ;;  %v494_v22 = vld [vmem:[%s650_s3 + $0x20] sm:$0xff]   ;;  %v495_v23 = vld [vmem:[%s650_s3 + $0x28] sm:$0xff]   ;;  %v496_v32 = vld [vmem:[%s650_s3 + $0x30] sm:$0xff]  }
   0x9   :  { %v358_v24 = vld [vmem:[%s651_s4] ss:$0 sm:$0xff]  ;;  %v497_v33 = vld [vmem:[%s650_s3 + $0x38] sm:$0xff]   ;;  %v367_v34 = vld [vmem:[%s651_s4 + $0x1] ss:$0 sm:$0xff] }
   0xa   :  { %v376_v42 = vld [vmem:[%s651_s4 + $0x2] ss:$0 sm:$0xff] }
   0xb   :  { %417 = vmatpush3.bf16.msra.mxu0 %v476_v3  ;;  %437 = vmatpush3.bf16.msra.mxu1 %v484_v8 }
   0xc   :  { %418 = vmatprep.subr.bf16.mxu0 %v498_v0  ;;  %438 = vmatprep.subr.bf16.mxu1 %v498_v0 }
   0xf   :  { %419 = vmatpush3.bf16.msra.mxu0 %v477_v5  ;;  %439 = vmatpush3.bf16.msra.mxu1 %v485_v10 }
  0x10   :  { %420 = vmatprep.subr.bf16.mxu0 %v498_v0  ;;  %440 = vmatprep.subr.bf16.mxu1 %v498_v0 }
  0x13   :  { %421 = vmatpush3.bf16.msra.mxu0 %v478_v7  ;;  %441 = vmatpush3.bf16.msra.mxu1 %v486_v12 }
  0x14   :  { %422 = vmatprep.subr.bf16.mxu0 %v498_v0  ;;  %442 = vmatprep.subr.bf16.mxu1 %v498_v0 }
  0x17   :  { %423 = vmatpush3.bf16.msra.mxu0 %v479_v9  ;;  %443 = vmatpush3.bf16.msra.mxu1 %v487_v14 }
  0x18   :  { %424 = vmatprep.subr.bf16.mxu0 %v498_v0  ;;  %444 = vmatprep.subr.bf16.mxu1 %v498_v0 }
  0x1b   :  { %425 = vmatpush3.bf16.msra.mxu0 %v480_v11  ;;  %445 = vmatpush3.bf16.msra.mxu1 %v488_v16 }
  0x1c   :  { %426 = vmatprep.subr.bf16.mxu0 %v498_v0  ;;  %446 = vmatprep.subr.bf16.mxu1 %v498_v0 }
  0x1f   :  { %427 = vmatpush3.bf16.msra.mxu0 %v481_v13  ;;  %447 = vmatpush3.bf16.msra.mxu1 %v489_v17 }
  0x20   :  { %452 = vmatprep.subr.bf16.mxu0 %v498_v0 }
  0x22   :  { %429 = vmatmul.mubr.bf16.vlgmr.msra.gmra.mrb[0].mxu0 %v21_v15 }
  0x23   :  { %468 = vmatprep.mubr.msk.bf16.mxu0 %vm499_vm0, %v498_v0  ;;  %453 = vmatpush3.bf16.msra.mxu0 %v490_v18 }
  0x24   :  { %454 = vmatprep.subr.bf16.mxu0 %v498_v0 }
  0x27   :  { %455 = vmatpush3.bf16.msra.mxu0 %v491_v19 }
  0x28   :  { %456 = vmatprep.subr.bf16.mxu0 %v498_v0 }
  0x2b   :  { %457 = vmatpush3.bf16.msra.mxu0 %v492_v20 }
  0x2c   :  { %458 = vmatprep.subr.bf16.mxu0 %v498_v0 }
  0x2f   :  { %459 = vmatpush3.bf16.msra.mxu0 %v493_v21 }
  0x30   :  { %460 = vmatprep.subr.bf16.mxu0 %v498_v0 }
  0x33   :  { %461 = vmatpush3.bf16.msra.mxu0 %v494_v22 }
  0x34   :  { %462 = vmatprep.subr.bf16.mxu0 %v498_v0 }
  0x37   :  { %463 = vmatpush3.bf16.msra.mxu0 %v495_v23 }
  0x38   :  { %464 = vmatprep.subr.bf16.mxu0 %v498_v0 }
  0x3b   :  { %465 = vmatpush3.bf16.msra.mxu0 %v496_v32 }
  0x3c   :  { %466 = vmatprep.subr.bf16.mxu0 %v498_v0 }
  0x3f   :  { %467 = vmatpush3.bf16.msra.mxu0 %v497_v33 }
  0xf5   :  { %v125_v25 = vpop.f32.mrb[0].mxu0 }
  0xf6   :  { %v126_v26 = vadd.f32 %v358_v24, %v125_v25  ;;  %v430_v27 = vpop.f32.mrb[1].mxu0 }
  0xf7   :  { %v128_v28 = vpop.f32.mrb[2].mxu0 }
  0xf8   :  { %v131_v29 = vmax.f32 %v126_v26, 0.0  ;;  %v431_v30 = vpop.f32.mrb[3].mxu0 }
  0xfa   :  { %v132_v31 = vpack.c.bf16 %v131_v29, %v131_v29 }
  0xfc   :  { %449 = vmatmul.mubr.bf16.vlgmr.msra.gmra.mrb[0].mxu1 %v132_v31 }
 0x1cf   :  { %v236_v35 = vpop.f32.mrb[0].mxu1 }
 0x1d0   :  { %v237_v36 = vadd.f32 %v367_v34, %v236_v35  ;;  %v450_v37 = vpop.f32.mrb[1].mxu1 }
 0x1d1   :  { %v239_v38 = vpop.f32.mrb[2].mxu1 }
 0x1d2   :  { %v242_v39 = vmax.f32 %v237_v36, 0.0  ;;  %v451_v40 = vpop.f32.mrb[3].mxu1 }
 0x1d4   :  { %v243_v41 = vpack.c.bf16 %v242_v39, %v242_v39 }
 0x1d6   :  { %469 = vmatmul.mubr.bf16.vlgmr.msra.gmra.mrb[4].mxu0 %v243_v41 }
 0x2a9   :  { %v347_v43 = vpop.f32.mrb[4].mxu0 }
 0x2aa   :  { %v348_v44 = vadd.f32 %v376_v42, %v347_v43  ;;  %v470_v45 = vpop.f32.mrb[5].mxu0 }
 0x2ab   :  { %v350_v46 = vpop.f32.mrb[6].mxu0 }
 0x2ac   :  { %353 = vst [vmem:[%s652_s5] sm:$0xff] %v348_v44  ;;  %v471_v47 = vpop.f32.mrb[7].mxu0 }

</bundles_post_ra>
